<compile_context>
chip_gen: v6e
topology: v6e:2x2x1
jax: 0.10.0
libtpu: 0.0.40
codegen_flags: <defaults>
</compile_context>

<pallas_src>
import math

import jax
import jax.numpy as jnp
from jax.experimental import pallas as pl
from jax.experimental.pallas import tpu as pltpu


# ----------------------------------------------------------------------------
# Tiling / VMEM helpers
# ----------------------------------------------------------------------------
def _round_up(x, m):
    return (x + m - 1) // m * m


def _padded_block_bytes(block_shape, itemsize):
    """VMEM bytes of one block after (sublane, 128-lane) tile padding."""
    s = list(block_shape)
    s[-1] = _round_up(s[-1], 128)
    if len(s) >= 2:
        sublane = 8 if itemsize >= 4 else 8 * (4 // itemsize)   # 8 f32 / 16 bf16
        s[-2] = _round_up(s[-2], sublane)
    n = 1
    for d in s:
        n *= d
    return n * itemsize


def _vmem_limit_and_budget():
    """Generation-aware scoped-VMEM limit plus a tiling budget with headroom."""
    try:
        cap = int(pltpu.get_tpu_info().vmem_capacity_bytes)
    except Exception:
        cap = 64 * 1024 * 1024              # conservative: v7x per-core VMEM
    limit = int(min(100 * 1024 * 1024, (cap * 3) // 4))   # ~48 MiB v7x, ~96 MiB v5e/v6e
    budget = (limit * 3) // 5               # headroom for compiler scratch etc.
    return limit, budget


def _choose_freq_tile(nf, block_bytes_fn, budget_bytes, align, min_steps=4):
    """Pick the frequency tile TNF and padded band length NFp (multiple of TNF).

    block_bytes_fn(tnf) must return the PADDED, multi-buffered working set of
    one grid step.  TNF is a multiple of `align` (128 when frequencies sit on
    the lane axis, 16 for the bf16 MXU path where they sit on a second-minor
    axis) unless the whole band fits in one block.  Long bands keep at least
    `min_steps` grid steps so the dominant weight DMA pipelines behind compute
    and multiple cores can split the band.
    """
    nfp_a = _round_up(nf, align)
    if nfp_a <= max(align, 128):
        # Tiny band (the common case: total_freqs ~ length/2+1 split into bands).
        tnf = nfp_a
        while tnf > align and block_bytes_fn(tnf) > budget_bytes:
            tnf -= align
        if tnf >= nfp_a:
            return nf, nf                  # one full-band resident block
        return tnf, _round_up(nf, tnf)
    # Largest aligned tile whose padded, double-buffered footprint fits ...
    tnf = align
    while tnf + align <= nfp_a and block_bytes_fn(tnf + align) <= budget_bytes:
        tnf += align
    # ... capped so the grid never collapses to a single step.
    steps_cap = max(align, (nfp_a // min_steps) // align * align)
    tnf = max(align, min(tnf, steps_cap))
    return tnf, _round_up(nf, tnf)


# ----------------------------------------------------------------------------
# Kernels
# ----------------------------------------------------------------------------
def _banded_fourier_vpu_kernel(x_ref, w_ref, b_ref, o_ref):
    """Frequencies-on-lanes VPU path (small Cin/Cout).

    x_ref : (2, B, Cin, TNF)     real/imag | batch | in-chan (sublanes) | freq (lanes)
    w_ref : (2, Cin, Cout, TNF)  real/imag | in-chan | out-chan (sublanes) | freq (lanes)
    b_ref : (2, Cout, TNF)
    o_ref : (2, B, Cout, TNF)
    """
    cin = x_ref.shape[2]
    xr = x_ref[0]                      # (B, Cin, TNF)
    xi = x_ref[1]
    wr = w_ref[0]                      # (Cin, Cout, TNF)
    wi = w_ref[1]
    out_r = b_ref[0][None]             # (1, Cout, TNF) -> broadcasts over batch
    out_i = b_ref[1][None]
    # Contract the (small, static) Cin axis with VPU FMAs; the live
    # intermediate stays at (B, Cout, TNF), never (B, Cin, Cout, TNF).
    for i in range(cin):
        xr_i = xr[:, i:i + 1, :]       # (B, 1, TNF): broadcast over Cout sublanes
        xi_i = xi[:, i:i + 1, :]
        wr_i = wr[i][None]             # (1, Cout, TNF): broadcast over batch
        wi_i = wi[i][None]
        out_r = out_r + (xr_i * wr_i - xi_i * wi_i)
        out_i = out_i + (xr_i * wi_i + xi_i * wr_i)
    o_ref[0] = out_r
    o_ref[1] = out_i


def _banded_fourier_mxu_kernel(x_ref, w_ref, b_ref, o_ref):
    """Packed complex->real batched matmul (large Cin/Cout), bf16 in / f32 acc.

    x_ref : (TNF, B, 2Cin)     bf16, packed [xr | xi]
    w_ref : (TNF, 2Cin, 2Cout) bf16, packed [[wr, wi], [-wi, wr]]
    b_ref : (TNF, 2Cout)       f32,  packed [br | bi]
    o_ref : (TNF, B, 2Cout)    f32,  packed [out_r | out_i]
    """
    acc = jnp.einsum("fbi,fio->fbo", x_ref[...], w_ref[...],
                     preferred_element_type=jnp.float32)
    o_ref[...] = acc + b_ref[...][:, None, :]


# ----------------------------------------------------------------------------
# Path wrappers
# ----------------------------------------------------------------------------
def _vpu_path(xr, xi, wr, wi, br, bi, vmem_limit, vmem_budget):
    """Frequencies on the 128-lane axis; channels on sublanes; VPU FMAs."""
    b, nf, cin = xr.shape
    cout = wr.shape[2]

    def block_bytes(tnf):
        return 2 * (_padded_block_bytes((2, b, cin, tnf), 4)
                    + _padded_block_bytes((2, cin, cout, tnf), 4)
                    + _padded_block_bytes((2, cout, tnf), 4)
                    + _padded_block_bytes((2, b, cout, tnf), 4))

    tnf, nfp = _choose_freq_tile(nf, block_bytes, vmem_budget, align=128)
    pad = nfp - nf

    # These layout changes fuse into the real/imag packing copy (one HBM write).
    x_packed = jnp.transpose(jnp.stack([xr, xi], axis=0), (0, 1, 3, 2))   # (2,B,Cin,NF)
    w_packed = jnp.transpose(jnp.stack([wr, wi], axis=0), (0, 2, 3, 1))   # (2,Cin,Cout,NF)
    b_packed = jnp.transpose(jnp.stack([br, bi], axis=0), (0, 2, 1))      # (2,Cout,NF)
    if pad:
        x_packed = jnp.pad(x_packed, ((0, 0), (0, 0), (0, 0), (0, pad)))
        w_packed = jnp.pad(w_packed, ((0, 0), (0, 0), (0, 0), (0, pad)))
        b_packed = jnp.pad(b_packed, ((0, 0), (0, 0), (0, pad)))

    grid = (nfp // tnf,)
    flops = 8 * b * nf * cin * cout           # one complex MAC = 8 real flops
    bytes_accessed = 4 * (x_packed.size + w_packed.size + b_packed.size
                          + 2 * b * cout * nfp)

    out = pl.pallas_call(
        _banded_fourier_vpu_kernel,
        grid=grid,
        in_specs=[
            pl.BlockSpec((2, b, cin, tnf), lambda f: (0, 0, 0, f)),
            pl.BlockSpec((2, cin, cout, tnf), lambda f: (0, 0, 0, f)),
            pl.BlockSpec((2, cout, tnf), lambda f: (0, 0, f)),
        ],
        out_specs=pl.BlockSpec((2, b, cout, tnf), lambda f: (0, 0, 0, f)),
        out_shape=jax.ShapeDtypeStruct((2, b, cout, nfp), jnp.float32),
        compiler_params=pltpu.CompilerParams(
            dimension_semantics=("parallel",),
            vmem_limit_bytes=vmem_limit,
        ),
        cost_estimate=pl.CostEstimate(flops=flops, transcendentals=0,
                                      bytes_accessed=bytes_accessed),
    )(x_packed, w_packed, b_packed)

    out = out[..., :nf]                                   # (2, B, Cout, NF)
    out_c = jax.lax.complex(out[0], out[1])               # (B, Cout, NF)
    return jnp.transpose(out_c, (0, 2, 1))                # (B, NF, Cout)


def _mxu_path(xr, xi, wr, wi, br, bi, vmem_limit, vmem_budget):
    """Packed complex->real batched matmul on the MXU (2*Cin, 2*Cout >~ 128)."""
    b, nf, cin = xr.shape
    cout = wr.shape[2]
    k2, n2 = 2 * cin, 2 * cout

    def block_bytes(tnf):
        return 2 * (_padded_block_bytes((tnf, b, k2), 2)
                    + _padded_block_bytes((tnf, k2, n2), 2)
                    + _padded_block_bytes((tnf, n2), 4)
                    + _padded_block_bytes((tnf, b, n2), 4))

    tnf, nfp = _choose_freq_tile(nf, block_bytes, vmem_budget, align=16)
    pad = nfp - nf

    # bf16 streaming (f32 MXU accumulation) halves the dominant weight DMA.
    # The (NF, B, 2Cin) layout change fuses into this packing copy.
    x_packed = jnp.concatenate([xr, xi], axis=2)                          # (B,NF,2Cin)
    x_packed = jnp.transpose(x_packed, (1, 0, 2)).astype(jnp.bfloat16)    # (NF,B,2Cin)
    w_packed = jnp.concatenate(
        [jnp.concatenate([wr, wi], axis=2),
         jnp.concatenate([-wi, wr], axis=2)], axis=1).astype(jnp.bfloat16)  # (NF,2Cin,2Cout)
    b_packed = jnp.concatenate([br, bi], axis=1).astype(jnp.float32)      # (NF,2Cout)
    if pad:
        x_packed = jnp.pad(x_packed, ((0, pad), (0, 0), (0, 0)))
        w_packed = jnp.pad(w_packed, ((0, pad), (0, 0), (0, 0)))
        b_packed = jnp.pad(b_packed, ((0, pad), (0, 0)))

    grid = (nfp // tnf,)
    flops = 2 * b * nf * k2 * n2
    bytes_accessed = (2 * (x_packed.size + w_packed.size)
                      + 4 * (b_packed.size + nfp * b * n2))

    out = pl.pallas_call(
        _banded_fourier_mxu_kernel,
        grid=grid,
        in_specs=[
            pl.BlockSpec((tnf, b, k2), lambda f: (f, 0, 0)),
            pl.BlockSpec((tnf, k2, n2), lambda f: (f, 0, 0)),
            pl.BlockSpec((tnf, n2), lambda f: (f, 0)),
        ],
        out_specs=pl.BlockSpec((tnf, b, n2), lambda f: (f, 0, 0)),
        out_shape=jax.ShapeDtypeStruct((nfp, b, n2), jnp.float32),
        compiler_params=pltpu.CompilerParams(
            dimension_semantics=("parallel",),
            vmem_limit_bytes=vmem_limit,
        ),
        cost_estimate=pl.CostEstimate(flops=flops, transcendentals=0,
                                      bytes_accessed=bytes_accessed),
    )(x_packed, w_packed, b_packed)

    out = out[:nf]                                              # (NF, B, 2Cout)
    out_c = jax.lax.complex(out[..., :cout], out[..., cout:])   # (NF, B, Cout)
    return jnp.transpose(out_c, (1, 0, 2))                      # (B, NF, Cout)


# ----------------------------------------------------------------------------
# Public forward pass (matches BandedFourierLayer.forward)
# ----------------------------------------------------------------------------
def banded_fourier_layer(x, wr, wi, br, bi, band, num_bands, *, force_path=None):
    """x : (B, T, Cin) float32 -> (B, T, Cout) float32.

    wr/wi : (NF, Cin, Cout) real/imag weight; br/bi : (NF, Cout) real/imag bias.
    """
    b, t, cin = x.shape
    total_freqs = t // 2 + 1
    nf, _, cout = wr.shape
    start = band * (total_freqs // num_bands)
    end = start + nf

    # TODO(synk): rfft/irfft have no clean Pallas TPU primitive; they stay in jnp.fft.
    x_fft = jnp.fft.rfft(x, axis=1)                   # (B, total_freqs, Cin) c64
    x_band = x_fft[:, start:end]                      # (B, NF, Cin)
    xr = jnp.real(x_band).astype(jnp.float32)
    xi = jnp.imag(x_band).astype(jnp.float32)

    vmem_limit, vmem_budget = _vmem_limit_and_budget()

    use_mxu = (2 * cin >= 128) and (2 * cout >= 128)
    if force_path == "mxu":
        use_mxu = True
    elif force_path == "vpu":
        use_mxu = False

    if use_mxu:
        out_band = _mxu_path(xr, xi, wr, wi, br, bi, vmem_limit, vmem_budget)
    else:
        out_band = _vpu_path(xr, xi, wr, wi, br, bi, vmem_limit, vmem_budget)

    out_fft = jnp.zeros((b, total_freqs, cout), dtype=jnp.complex64)
    out_fft = out_fft.at[:, start:end].set(out_band)
    return jnp.fft.irfft(out_fft, n=t, axis=1).astype(jnp.float32)


def _reference(x, wr, wi, br, bi, band, num_bands):
    """Pure-JAX reference reproducing the PyTorch forward."""
    b, t, _ = x.shape
    total_freqs = t // 2 + 1
    nf, _, cout = wr.shape
    start = band * (total_freqs // num_bands)
    end = start + nf
    x_fft = jnp.fft.rfft(x, axis=1)
    w = wr + 1j * wi
    bias = br + 1j * bi
    out_band = jnp.einsum('bti,tio->bto', x_fft[:, start:end], w,
                          precision=jax.lax.Precision.HIGHEST) + bias[None]
    out_fft = jnp.zeros((b, total_freqs, cout), dtype=jnp.complex64)
    out_fft = out_fft.at[:, start:end].set(out_band)
    return jnp.fft.irfft(out_fft, n=t, axis=1)


if __name__ == "__main__":
    # Small shapes consistent with the module: (B, T, Cin) -> (B, T, Cout).
    B, T, Cin, Cout = 2, 16, 4, 8
    band, num_bands = 0, 2
    total_freqs = T // 2 + 1
    num_freqs = total_freqs // num_bands + (
        total_freqs % num_bands if band == num_bands - 1 else 0)

    key = jax.random.PRNGKey(0)
    k_x, k_wr, k_wi, k_br, k_bi = jax.random.split(key, 5)

    # Deterministic synthetic init mimicking kaiming_uniform(a=sqrt(5)):
    # bound = 1/sqrt(fan_in); PyTorch fan_in for (NF, Cin, Cout) = Cin*Cout.
    fan_in = Cin * Cout
    bound = 1.0 / math.sqrt(fan_in)
    wr = jax.random.uniform(k_wr, (num_freqs, Cin, Cout), jnp.float32, -bound, bound)
    wi = jax.random.uniform(k_wi, (num_freqs, Cin, Cout), jnp.float32, -bound, bound)
    br = jax.random.uniform(k_br, (num_freqs, Cout), jnp.float32, -bound, bound)
    bi = jax.random.uniform(k_bi, (num_freqs, Cout), jnp.float32, -bound, bound)

    x = jax.random.normal(k_x, (B, T, Cin), jnp.float32)

    ref = jax.block_until_ready(_reference(x, wr, wi, br, bi, band, num_bands))

    # Natural path for this module's small channel counts: frequencies-on-lanes
    # VPU kernel, exact f32 math.
    out = jax.block_until_ready(
        banded_fourier_layer(x, wr, wi, br, bi, band, num_bands))
    assert out.shape == (B, T, Cout)
    assert jnp.allclose(out, ref, atol=1e-4, rtol=1e-4), "VPU path mismatch vs reference"

    # Large-channel fallback path (forced here at small shapes): packed
    # complex->real batched matmul, bf16-streamed -> looser tolerance.
    out_mxu = jax.block_until_ready(
        banded_fourier_layer(x, wr, wi, br, bi, band, num_bands, force_path="mxu"))
    assert out_mxu.shape == (B, T, Cout)
    assert jnp.allclose(out_mxu, ref, atol=5e-2, rtol=5e-2), "MXU path mismatch vs reference"

    print("KERNEL_OK")
</pallas_src>

<mosaic_0001>
module attributes {stable_mosaic.version = 11 : i64} {
  func.func @_banded_fourier_vpu_kernel(%arg0: i32, %arg1: memref<2x2x4x4xf32, #tpu.memory_space<vmem>>, %arg2: memref<2x4x8x4xf32, #tpu.memory_space<vmem>>, %arg3: memref<2x8x4xf32, #tpu.memory_space<vmem>>, %arg4: memref<2x2x8x4xf32, #tpu.memory_space<vmem>>) attributes {dimension_semantics = [#tpu.dimension_semantics<parallel>], iteration_bounds = array<i64: 1>, scalar_prefetch = 0 : i64, scratch_operands = 0 : i64, tpu.core_type = #tpu.core_type<tc>, window_params = [{transform_indices = @transform_0, window_bounds = array<i64: 2, 2, 4, 4>}, {transform_indices = @transform_1, window_bounds = array<i64: 2, 4, 8, 4>}, {transform_indices = @transform_2, window_bounds = array<i64: 2, 8, 4>}, {transform_indices = @transform_3, window_bounds = array<i64: 2, 2, 8, 4>}]} {
    %c0 = arith.constant 0 : index
    %c0_0 = arith.constant 0 : index
    %c0_1 = arith.constant 0 : index
    %c0_2 = arith.constant 0 : index
    %0 = vector.load %arg1[%c0, %c0_0, %c0_1, %c0_2] : memref<2x2x4x4xf32, #tpu.memory_space<vmem>>, vector<1x2x4x4xf32>
    %1 = vector.shape_cast %0 : vector<1x2x4x4xf32> to vector<2x4x4xf32>
    %c1 = arith.constant 1 : index
    %c0_3 = arith.constant 0 : index
    %c0_4 = arith.constant 0 : index
    %c0_5 = arith.constant 0 : index
    %2 = vector.load %arg1[%c1, %c0_3, %c0_4, %c0_5] : memref<2x2x4x4xf32, #tpu.memory_space<vmem>>, vector<1x2x4x4xf32>
    %3 = vector.shape_cast %2 : vector<1x2x4x4xf32> to vector<2x4x4xf32>
    %c0_6 = arith.constant 0 : index
    %c0_7 = arith.constant 0 : index
    %c0_8 = arith.constant 0 : index
    %c0_9 = arith.constant 0 : index
    %4 = vector.load %arg2[%c0_6, %c0_7, %c0_8, %c0_9] : memref<2x4x8x4xf32, #tpu.memory_space<vmem>>, vector<1x4x8x4xf32>
    %5 = vector.shape_cast %4 : vector<1x4x8x4xf32> to vector<4x8x4xf32>
    %c1_10 = arith.constant 1 : index
    %c0_11 = arith.constant 0 : index
    %c0_12 = arith.constant 0 : index
    %c0_13 = arith.constant 0 : index
    %6 = vector.load %arg2[%c1_10, %c0_11, %c0_12, %c0_13] : memref<2x4x8x4xf32, #tpu.memory_space<vmem>>, vector<1x4x8x4xf32>
    %7 = vector.shape_cast %6 : vector<1x4x8x4xf32> to vector<4x8x4xf32>
    %c0_14 = arith.constant 0 : index
    %c0_15 = arith.constant 0 : index
    %c0_16 = arith.constant 0 : index
    %8 = vector.load %arg3[%c0_14, %c0_15, %c0_16] : memref<2x8x4xf32, #tpu.memory_space<vmem>>, vector<1x8x4xf32>
    %9 = vector.shape_cast %8 : vector<1x8x4xf32> to vector<8x4xf32>
    %10 = vector.shape_cast %9 : vector<8x4xf32> to vector<1x8x4xf32>
    %c1_17 = arith.constant 1 : index
    %c0_18 = arith.constant 0 : index
    %c0_19 = arith.constant 0 : index
    %11 = vector.load %arg3[%c1_17, %c0_18, %c0_19] : memref<2x8x4xf32, #tpu.memory_space<vmem>>, vector<1x8x4xf32>
    %12 = vector.shape_cast %11 : vector<1x8x4xf32> to vector<8x4xf32>
    %13 = vector.shape_cast %12 : vector<8x4xf32> to vector<1x8x4xf32>
    %14 = vector.extract_strided_slice %1 {offsets = [0, 0, 0], sizes = [2, 1, 4], strides = [1, 1, 1]} : vector<2x4x4xf32> to vector<2x1x4xf32>
    %15 = vector.extract_strided_slice %3 {offsets = [0, 0, 0], sizes = [2, 1, 4], strides = [1, 1, 1]} : vector<2x4x4xf32> to vector<2x1x4xf32>
    %16 = vector.extract_strided_slice %5 {offsets = [0, 0, 0], sizes = [1, 8, 4], strides = [1, 1, 1]} : vector<4x8x4xf32> to vector<1x8x4xf32>
    %17 = vector.shape_cast %16 : vector<1x8x4xf32> to vector<8x4xf32>
    %18 = vector.shape_cast %17 : vector<8x4xf32> to vector<1x8x4xf32>
    %19 = vector.extract_strided_slice %7 {offsets = [0, 0, 0], sizes = [1, 8, 4], strides = [1, 1, 1]} : vector<4x8x4xf32> to vector<1x8x4xf32>
    %20 = vector.shape_cast %19 : vector<1x8x4xf32> to vector<8x4xf32>
    %21 = vector.shape_cast %20 : vector<8x4xf32> to vector<1x8x4xf32>
    %22 = vector.broadcast %14 : vector<2x1x4xf32> to vector<2x8x4xf32>
    %23 = vector.broadcast %18 : vector<1x8x4xf32> to vector<2x8x4xf32>
    %24 = arith.mulf %22, %23 : vector<2x8x4xf32>
    %25 = vector.broadcast %15 : vector<2x1x4xf32> to vector<2x8x4xf32>
    %26 = vector.broadcast %21 : vector<1x8x4xf32> to vector<2x8x4xf32>
    %27 = arith.mulf %25, %26 : vector<2x8x4xf32>
    %28 = arith.subf %24, %27 : vector<2x8x4xf32>
    %29 = vector.broadcast %10 : vector<1x8x4xf32> to vector<2x8x4xf32>
    %30 = arith.addf %29, %28 : vector<2x8x4xf32>
    %31 = vector.broadcast %14 : vector<2x1x4xf32> to vector<2x8x4xf32>
    %32 = vector.broadcast %21 : vector<1x8x4xf32> to vector<2x8x4xf32>
    %33 = arith.mulf %31, %32 : vector<2x8x4xf32>
    %34 = vector.broadcast %15 : vector<2x1x4xf32> to vector<2x8x4xf32>
    %35 = vector.broadcast %18 : vector<1x8x4xf32> to vector<2x8x4xf32>
    %36 = arith.mulf %34, %35 : vector<2x8x4xf32>
    %37 = arith.addf %33, %36 : vector<2x8x4xf32>
    %38 = vector.broadcast %13 : vector<1x8x4xf32> to vector<2x8x4xf32>
    %39 = arith.addf %38, %37 : vector<2x8x4xf32>
    %40 = vector.extract_strided_slice %1 {offsets = [0, 1, 0], sizes = [2, 1, 4], strides = [1, 1, 1]} : vector<2x4x4xf32> to vector<2x1x4xf32>
    %41 = vector.extract_strided_slice %3 {offsets = [0, 1, 0], sizes = [2, 1, 4], strides = [1, 1, 1]} : vector<2x4x4xf32> to vector<2x1x4xf32>
    %42 = vector.extract_strided_slice %5 {offsets = [1, 0, 0], sizes = [1, 8, 4], strides = [1, 1, 1]} : vector<4x8x4xf32> to vector<1x8x4xf32>
    %43 = vector.shape_cast %42 : vector<1x8x4xf32> to vector<8x4xf32>
    %44 = vector.shape_cast %43 : vector<8x4xf32> to vector<1x8x4xf32>
    %45 = vector.extract_strided_slice %7 {offsets = [1, 0, 0], sizes = [1, 8, 4], strides = [1, 1, 1]} : vector<4x8x4xf32> to vector<1x8x4xf32>
    %46 = vector.shape_cast %45 : vector<1x8x4xf32> to vector<8x4xf32>
    %47 = vector.shape_cast %46 : vector<8x4xf32> to vector<1x8x4xf32>
    %48 = vector.broadcast %40 : vector<2x1x4xf32> to vector<2x8x4xf32>
    %49 = vector.broadcast %44 : vector<1x8x4xf32> to vector<2x8x4xf32>
    %50 = arith.mulf %48, %49 : vector<2x8x4xf32>
    %51 = vector.broadcast %41 : vector<2x1x4xf32> to vector<2x8x4xf32>
    %52 = vector.broadcast %47 : vector<1x8x4xf32> to vector<2x8x4xf32>
    %53 = arith.mulf %51, %52 : vector<2x8x4xf32>
    %54 = arith.subf %50, %53 : vector<2x8x4xf32>
    %55 = arith.addf %30, %54 : vector<2x8x4xf32>
    %56 = vector.broadcast %40 : vector<2x1x4xf32> to vector<2x8x4xf32>
    %57 = vector.broadcast %47 : vector<1x8x4xf32> to vector<2x8x4xf32>
    %58 = arith.mulf %56, %57 : vector<2x8x4xf32>
    %59 = vector.broadcast %41 : vector<2x1x4xf32> to vector<2x8x4xf32>
    %60 = vector.broadcast %44 : vector<1x8x4xf32> to vector<2x8x4xf32>
    %61 = arith.mulf %59, %60 : vector<2x8x4xf32>
    %62 = arith.addf %58, %61 : vector<2x8x4xf32>
    %63 = arith.addf %39, %62 : vector<2x8x4xf32>
    %64 = vector.extract_strided_slice %1 {offsets = [0, 2, 0], sizes = [2, 1, 4], strides = [1, 1, 1]} : vector<2x4x4xf32> to vector<2x1x4xf32>
    %65 = vector.extract_strided_slice %3 {offsets = [0, 2, 0], sizes = [2, 1, 4], strides = [1, 1, 1]} : vector<2x4x4xf32> to vector<2x1x4xf32>
    %66 = vector.extract_strided_slice %5 {offsets = [2, 0, 0], sizes = [1, 8, 4], strides = [1, 1, 1]} : vector<4x8x4xf32> to vector<1x8x4xf32>
    %67 = vector.shape_cast %66 : vector<1x8x4xf32> to vector<8x4xf32>
    %68 = vector.shape_cast %67 : vector<8x4xf32> to vector<1x8x4xf32>
    %69 = vector.extract_strided_slice %7 {offsets = [2, 0, 0], sizes = [1, 8, 4], strides = [1, 1, 1]} : vector<4x8x4xf32> to vector<1x8x4xf32>
    %70 = vector.shape_cast %69 : vector<1x8x4xf32> to vector<8x4xf32>
    %71 = vector.shape_cast %70 : vector<8x4xf32> to vector<1x8x4xf32>
    %72 = vector.broadcast %64 : vector<2x1x4xf32> to vector<2x8x4xf32>
    %73 = vector.broadcast %68 : vector<1x8x4xf32> to vector<2x8x4xf32>
    %74 = arith.mulf %72, %73 : vector<2x8x4xf32>
    %75 = vector.broadcast %65 : vector<2x1x4xf32> to vector<2x8x4xf32>
    %76 = vector.broadcast %71 : vector<1x8x4xf32> to vector<2x8x4xf32>
    %77 = arith.mulf %75, %76 : vector<2x8x4xf32>
    %78 = arith.subf %74, %77 : vector<2x8x4xf32>
    %79 = arith.addf %55, %78 : vector<2x8x4xf32>
    %80 = vector.broadcast %64 : vector<2x1x4xf32> to vector<2x8x4xf32>
    %81 = vector.broadcast %71 : vector<1x8x4xf32> to vector<2x8x4xf32>
    %82 = arith.mulf %80, %81 : vector<2x8x4xf32>
    %83 = vector.broadcast %65 : vector<2x1x4xf32> to vector<2x8x4xf32>
    %84 = vector.broadcast %68 : vector<1x8x4xf32> to vector<2x8x4xf32>
    %85 = arith.mulf %83, %84 : vector<2x8x4xf32>
    %86 = arith.addf %82, %85 : vector<2x8x4xf32>
    %87 = arith.addf %63, %86 : vector<2x8x4xf32>
    %88 = vector.extract_strided_slice %1 {offsets = [0, 3, 0], sizes = [2, 1, 4], strides = [1, 1, 1]} : vector<2x4x4xf32> to vector<2x1x4xf32>
    %89 = vector.extract_strided_slice %3 {offsets = [0, 3, 0], sizes = [2, 1, 4], strides = [1, 1, 1]} : vector<2x4x4xf32> to vector<2x1x4xf32>
    %90 = vector.extract_strided_slice %5 {offsets = [3, 0, 0], sizes = [1, 8, 4], strides = [1, 1, 1]} : vector<4x8x4xf32> to vector<1x8x4xf32>
    %91 = vector.shape_cast %90 : vector<1x8x4xf32> to vector<8x4xf32>
    %92 = vector.shape_cast %91 : vector<8x4xf32> to vector<1x8x4xf32>
    %93 = vector.extract_strided_slice %7 {offsets = [3, 0, 0], sizes = [1, 8, 4], strides = [1, 1, 1]} : vector<4x8x4xf32> to vector<1x8x4xf32>
    %94 = vector.shape_cast %93 : vector<1x8x4xf32> to vector<8x4xf32>
    %95 = vector.shape_cast %94 : vector<8x4xf32> to vector<1x8x4xf32>
    %96 = vector.broadcast %88 : vector<2x1x4xf32> to vector<2x8x4xf32>
    %97 = vector.broadcast %92 : vector<1x8x4xf32> to vector<2x8x4xf32>
    %98 = arith.mulf %96, %97 : vector<2x8x4xf32>
    %99 = vector.broadcast %89 : vector<2x1x4xf32> to vector<2x8x4xf32>
    %100 = vector.broadcast %95 : vector<1x8x4xf32> to vector<2x8x4xf32>
    %101 = arith.mulf %99, %100 : vector<2x8x4xf32>
    %102 = arith.subf %98, %101 : vector<2x8x4xf32>
    %103 = arith.addf %79, %102 : vector<2x8x4xf32>
    %104 = vector.broadcast %88 : vector<2x1x4xf32> to vector<2x8x4xf32>
    %105 = vector.broadcast %95 : vector<1x8x4xf32> to vector<2x8x4xf32>
    %106 = arith.mulf %104, %105 : vector<2x8x4xf32>
    %107 = vector.broadcast %89 : vector<2x1x4xf32> to vector<2x8x4xf32>
    %108 = vector.broadcast %92 : vector<1x8x4xf32> to vector<2x8x4xf32>
    %109 = arith.mulf %107, %108 : vector<2x8x4xf32>
    %110 = arith.addf %106, %109 : vector<2x8x4xf32>
    %111 = arith.addf %87, %110 : vector<2x8x4xf32>
    %c0_20 = arith.constant 0 : index
    %c0_21 = arith.constant 0 : index
    %c0_22 = arith.constant 0 : index
    %c0_23 = arith.constant 0 : index
    %112 = vector.load %arg4[%c0_20, %c0_21, %c0_22, %c0_23] : memref<2x2x8x4xf32, #tpu.memory_space<vmem>>, vector<1x2x8x4xf32>
    %113 = vector.shape_cast %112 : vector<1x2x8x4xf32> to vector<2x8x4xf32>
    %114 = vector.shape_cast %103 : vector<2x8x4xf32> to vector<1x2x8x4xf32>
    tpu.vector_store %arg4[%c0_20, %c0_21, %c0_22, %c0_23], %114 {strides = array<i32>} : memref<2x2x8x4xf32, #tpu.memory_space<vmem>>, vector<1x2x8x4xf32>,
    %c1_24 = arith.constant 1 : index
    %c0_25 = arith.constant 0 : index
    %c0_26 = arith.constant 0 : index
    %c0_27 = arith.constant 0 : index
    %115 = vector.load %arg4[%c1_24, %c0_25, %c0_26, %c0_27] : memref<2x2x8x4xf32, #tpu.memory_space<vmem>>, vector<1x2x8x4xf32>
    %116 = vector.shape_cast %115 : vector<1x2x8x4xf32> to vector<2x8x4xf32>
    %117 = vector.shape_cast %111 : vector<2x8x4xf32> to vector<1x2x8x4xf32>
    tpu.vector_store %arg4[%c1_24, %c0_25, %c0_26, %c0_27], %117 {strides = array<i32>} : memref<2x2x8x4xf32, #tpu.memory_space<vmem>>, vector<1x2x8x4xf32>,
    return
  }
  func.func @transform_0(%arg0: i32) -> (i32, i32, i32, i32) {
    %c0_i32 = arith.constant 0 : i32
    %c0_i32_0 = arith.constant 0 : i32
    %c0_i32_1 = arith.constant 0 : i32
    %c0_i32_2 = arith.constant 0 : i32
    return %c0_i32, %c0_i32_0, %c0_i32_1, %arg0 : i32, i32, i32, i32
  }
  func.func @transform_1(%arg0: i32) -> (i32, i32, i32, i32) {
    %c0_i32 = arith.constant 0 : i32
    %c0_i32_0 = arith.constant 0 : i32
    %c0_i32_1 = arith.constant 0 : i32
    %c0_i32_2 = arith.constant 0 : i32
    return %c0_i32, %c0_i32_0, %c0_i32_1, %arg0 : i32, i32, i32, i32
  }
  func.func @transform_2(%arg0: i32) -> (i32, i32, i32) {
    %c0_i32 = arith.constant 0 : i32
    %c0_i32_0 = arith.constant 0 : i32
    %c0_i32_1 = arith.constant 0 : i32
    return %c0_i32, %c0_i32_0, %arg0 : i32, i32, i32
  }
  func.func @transform_3(%arg0: i32) -> (i32, i32, i32, i32) {
    %c0_i32 = arith.constant 0 : i32
    %c0_i32_0 = arith.constant 0 : i32
    %c0_i32_1 = arith.constant 0 : i32
    %c0_i32_2 = arith.constant 0 : i32
    return %c0_i32, %c0_i32_0, %c0_i32_1, %arg0 : i32, i32, i32, i32
  }
}

</mosaic_0001>

<bundles_post_ra>
// kernel: tpu_custom_call.1
= control target key start
LH: loop header
LB: loop body
LE: loop exit
PB: predicated region body
PF: predicated region fallthrough
CT: control target
= control target key end

     0   :  { %v31_v0 = vlaneseq  ;;  %vm159_vm0 = vcmask 31744   ;;  %s304_s0 = inlined_call_operand.vmem [shape: f32[2,2,4,4], index: 0, kind: input, shape index: {}]   ;;  %s305_s1 = inlined_call_operand.vmem [shape: f32[2,4,8,4], index: 1, kind: input, shape index: {}]   ;;  %s306_s2 = inlined_call_operand.vmem [shape: f32[2,8,4], index: 2, kind: input, shape index: {}]   ;;  %s307_s3 = inlined_call_operand.vmem [shape: f32[2,2,8,4], index: 3, kind: output, shape index: {}]  }
   0x1   :  { %v14_v2 = vld [vmem:[%s304_s0] sm:$0xf]  ;;  %v169_v3 = vld [vmem:[%s304_s0 + $0x8] sm:$0xf]  ;;  %v217_v10 = vld [vmem:[%s305_s1 + $0x10] sm:$0xff] }
   0x2   :  { %v32_v1 = vshrl.u32 %v31_v0, 7  ;;  %v207_v4 = vld [vmem:[%s305_s1] sm:$0xff]  ;;  %v212_v5 = vld [vmem:[%s305_s1 + $0x8] sm:$0xff]  ;;  %v232_v13 = vld [vmem:[%s305_s1 + $0x18] sm:$0xff] }
   0x3   :  { %v222_v11 = vld [vmem:[%s305_s1 + $0x20] sm:$0xff]  ;;  %v227_v12 = vld [vmem:[%s305_s1 + $0x28] sm:$0xff]  ;;  %v237_v14 = vld [vmem:[%s305_s1 + $0x30] sm:$0xff] }
   0x4   :  { %v33_v6 = vsub.s32 0, %v32_v1  ;;  %v65_v7 = vsub.s32 1, %v32_v1  ;;  %v97_v8 = vsub.s32 2, %v32_v1  ;;  %v129_v9 = vsub.s32 3, %v32_v1  ;;  %v242_v15 = vld [vmem:[%s305_s1 + $0x38] sm:$0xff]  ;;  %v28_v30 = vld [vmem:[%s306_s2] sm:$0xff] }
   0x5   :  { %v15_v24 = vld [vmem:[%s304_s0 + $0x4] sm:$0xf]  ;;  %v170_v25 = vld [vmem:[%s304_s0 + $0xc] sm:$0xf] }
   0x6   :  { %v34_v16 = vrot.slane %v14_v2, %v33_v6  ;;  %v44_v17 = vrot.slane %v169_v3, %v33_v6  ;;  %v66_v18 = vrot.slane %v14_v2, %v65_v7  ;;  %v76_v19 = vrot.slane %v169_v3, %v65_v7  ;;  %v175_v0 = vld [vmem:[%s306_s2 + $0x8] sm:$0xff] }
   0x7   :  { %v98_v20 = vrot.slane %v14_v2, %v97_v8  ;;  %v108_v21 = vrot.slane %v169_v3, %v97_v8  ;;  %v130_v22 = vrot.slane %v14_v2, %v129_v9  ;;  %v140_v23 = vrot.slane %v169_v3, %v129_v9 }
   0x8   :  { %v39_v26 = vmul.f32 %v34_v16, %v207_v4  ;;  %v49_v27 = vmul.f32 %v222_v11, %v44_v17  ;;  %v71_v28 = vmul.f32 %v66_v18, %v212_v5  ;;  %v81_v29 = vmul.f32 %v227_v12, %v76_v19 }
   0x9   :  { %v103_v31 = vmul.f32 %v98_v20, %v217_v10  ;;  %v113_v32 = vmul.f32 %v237_v14, %v108_v21  ;;  %v135_v33 = vmul.f32 %v130_v22, %v232_v13  ;;  %v145_v34 = vmul.f32 %v242_v15, %v140_v23 }
   0xa   :  { %v51_v35 = vsub.f32 %v39_v26, %v49_v27  ;;  %v83_v36 = vsub.f32 %v71_v28, %v81_v29  ;;  %v38_v37 = vrot.slane %v15_v24, %v33_v6  ;;  %v48_v38 = vrot.slane %v170_v25, %v33_v6 }
   0xb   :  { %v115_v39 = vsub.f32 %v103_v31, %v113_v32  ;;  %v147_v40 = vsub.f32 %v135_v33, %v145_v34  ;;  %v70_v41 = vrot.slane %v15_v24, %v65_v7  ;;  %v80_v42 = vrot.slane %v170_v25, %v65_v7 }
   0xc   :  { %v53_v43 = vadd.f32 %v51_v35, %v28_v30  ;;  %v40_v44 = vmul.f32 %v38_v37, %v207_v4  ;;  %v50_v45 = vmul.f32 %v222_v11, %v48_v38  ;;  %v102_v46 = vrot.slane %v15_v24, %v97_v8 }
   0xd   :  { %v72_v47 = vmul.f32 %v70_v41, %v212_v5  ;;  %v82_v48 = vmul.f32 %v227_v12, %v80_v42  ;;  %v112_v49 = vrot.slane %v170_v25, %v97_v8  ;;  %v134_v50 = vrot.slane %v15_v24, %v129_v9 }
   0xe   :  { %v85_v51 = vadd.f32 %v83_v36, %v53_v43  ;;  %v52_v52 = vsub.f32 %v40_v44, %v50_v45  ;;  %v104_v53 = vmul.f32 %v102_v46, %v217_v10  ;;  %v144_v54 = vrot.slane %v170_v25, %v129_v9 }
   0xf   :  { %v84_v55 = vsub.f32 %v72_v47, %v82_v48  ;;  %v114_v56 = vmul.f32 %v237_v14, %v112_v49  ;;  %v136_v57 = vmul.f32 %v134_v50, %v232_v13  ;;  %v55_v58 = vmul.f32 %v222_v11, %v34_v16 }
  0x10   :  { %v117_v59 = vadd.f32 %v115_v39, %v85_v51  ;;  %v54_v60 = vadd.f32 %v52_v52, %v28_v30  ;;  %v146_v61 = vmul.f32 %v242_v15, %v144_v54  ;;  %v57_v62 = vmul.f32 %v44_v17, %v207_v4 }
  0x11   :  { %v116_v63 = vsub.f32 %v104_v53, %v114_v56  ;;  %v87_v1 = vmul.f32 %v227_v12, %v66_v18  ;;  %v89_v2 = vmul.f32 %v76_v19, %v212_v5  ;;  %v119_v3 = vmul.f32 %v237_v14, %v98_v20 }
  0x12   :  { %v149_v6 = vadd.f32 %v147_v40, %v117_v59  ;;  %v86_v7 = vadd.f32 %v84_v55, %v54_v60  ;;  %v148_v8 = vsub.f32 %v136_v57, %v146_v61  ;;  %v59_v9 = vadd.f32 %v57_v62, %v55_v58 }
  0x13   :  { %v91_v16 = vadd.f32 %v89_v2, %v87_v1  ;;  %v121_v24 = vmul.f32 %v108_v21, %v217_v10  ;;  %v151_v17 = vmul.f32 %v242_v15, %v130_v22  ;;  %v153_v25 = vmul.f32 %v140_v23, %v232_v13 }
  0x14   :  { %160 = vst.msk [vmem:[%s307_s3] sm:$0xff] %vm159_vm0, %v149_v6  ;;  %v118_v18 = vadd.f32 %v116_v63, %v86_v7  ;;  %v61_v19 = vadd.f32 %v175_v0, %v59_v9  ;;  %v56_v20 = vmul.f32 %v222_v11, %v38_v37  ;;  %v58_v26 = vmul.f32 %v48_v38, %v207_v4 }
  0x15   :  { %v123_v27 = vadd.f32 %v121_v24, %v119_v3  ;;  %v155_v28 = vadd.f32 %v153_v25, %v151_v17  ;;  %v88_v29 = vmul.f32 %v227_v12, %v70_v41  ;;  %v90_v21 = vmul.f32 %v80_v42, %v212_v5 }
  0x16   :  { %v150_v22 = vadd.f32 %v148_v8, %v118_v18  ;;  %v93_v30 = vadd.f32 %v91_v16, %v61_v19  ;;  %v60_v23 = vadd.f32 %v58_v26, %v56_v20  ;;  %v120_v31 = vmul.f32 %v237_v14, %v102_v46 }
  0x17   :  { %v92_v32 = vadd.f32 %v90_v21, %v88_v29  ;;  %v122_v33 = vmul.f32 %v112_v49, %v217_v10  ;;  %v152_v34 = vmul.f32 %v242_v15, %v134_v50  ;;  %v154_v11 = vmul.f32 %v144_v54, %v232_v13 }
  0x18   :  { %161 = vst.msk [vmem:[%s307_s3 + $0x8] sm:$0xff] %vm159_vm0, %v150_v22  ;;  %v125_v4 = vadd.f32 %v123_v27, %v93_v30  ;;  %v62_v12 = vadd.f32 %v175_v0, %v60_v23 }
  0x19   :  { %v124_v5 = vadd.f32 %v122_v33, %v120_v31  ;;  %v156_v37 = vadd.f32 %v154_v11, %v152_v34 }
  0x1a   :  { %v157_v35 = vadd.f32 %v155_v28, %v125_v4  ;;  %v94_v36 = vadd.f32 %v92_v32, %v62_v12 }
  0x1c   :  { %176 = vst.msk [vmem:[%s307_s3 + $0x10] sm:$0xff] %vm159_vm0, %v157_v35  ;;  %v126_v10 = vadd.f32 %v124_v5, %v94_v36 }
  0x1e   :  { %v158_v14 = vadd.f32 %v156_v37, %v126_v10 }
  0x20   :  { %177 = vst.msk [vmem:[%s307_s3 + $0x18] sm:$0xff] %vm159_vm0, %v158_v14 }

</bundles_post_ra>
